<compile_context>
chip_gen: v5e
topology: v5e:2x2
jax: 0.10.0
libtpu: 0.0.40
codegen_flags: <defaults>
</compile_context>

<pallas_src>
import jax
import jax.numpy as jnp
from jax.experimental import pallas as pl
from jax.experimental.pallas import tpu as pltpu

LANE = 128   # vreg lane count
SUB = 8      # vreg sublane count (f32)


def _sublane_align(dtype):
    """Native sublane multiple for a dtype (8 for f32, 16 for bf16, 32 for i8/fp8)."""
    return SUB * max(1, 4 // dtype.itemsize)


def _ref_jnp(pred, actual):
    """Plain-jnp SSLE for tiny tails / tiny inputs."""
    p = pred.astype(jnp.float32)
    a = actual.astype(jnp.float32)
    return jnp.sum((p - jnp.log(a + 1.0)) ** 2)


def _num_tensorcores():
    """Core split only helps on 2-TC chips (v7x); 1 on v5e/v6e."""
    try:
        kind = jax.devices()[0].device_kind.lower()
    except Exception:
        return 1
    return 2 if ("v7" in kind or "7x" in kind) else 1


def _make_kernel(tile, w, bpc, rows, need_mask):
    grp = tile // (w * SUB)

    def accum(out_ref, sq):
        # (tile,128) -> (grp, w, 8, 128) is layout-preserving (whole vregs are
        # only regrouped along the leading dim); the axis-0 sum is per-vreg
        # VPU adds into w independent accumulators (no XLU, short dep chains).
        part = jnp.sum(sq.reshape(grp, w, SUB, LANE), axis=0)
        out_ref[...] += part[None]

    def kernel(pred_ref, act_ref, out_ref):
        c = pl.program_id(0)   # TensorCore split (parallel axis)
        i = pl.program_id(1)   # reduction steps (arbitrary axis)

        @pl.when(i == 0)
        def _():
            out_ref[...] = jnp.zeros_like(out_ref)

        pred = pred_ref[...].astype(jnp.float32)
        act = act_ref[...].astype(jnp.float32)

        # Matches torch.log(actual + 1) exactly (log1p would be slightly more
        # accurate for tiny `actual`, but the spec uses log(x + 1)).
        diff = pred - jnp.log(act + 1.0)
        sq = diff * diff

        if not need_mask:
            accum(out_ref, sq)
        else:
            # Logical (unclamped) first row of this block.  Rows at/after
            # `rows` are either the out-of-bounds tail of a partial last
            # block or a fully-clamped duplicate block (v7x odd split).
            row0 = (c * bpc + i) * tile

            @pl.when(row0 + tile <= rows)     # full in-bounds block: no mask
            def _():
                accum(out_ref, sq)

            @pl.when(row0 + tile > rows)      # boundary / duplicate block
            def _():
                rid = row0 + jax.lax.broadcasted_iota(jnp.int32, (tile, 1), 0)
                # Single select on sq is safe: select does not propagate
                # NaN/Inf coming from garbage OOB rows.
                accum(out_ref, jnp.where(rid < rows, sq, 0.0))

    return kernel


def ssle_loss(pred, actual, *, tile_rows=8192):
    """sum((pred - log(actual + 1))**2) over all elements, via Pallas."""
    pred_f = pred.reshape(-1)
    act_f = actual.reshape(-1)
    n = pred_f.shape[0]

    align = max(_sublane_align(pred.dtype), _sublane_align(actual.dtype))
    rows = n // LANE                       # full lane-dense rows
    if rows < align:
        # Tiny input (< ~1 KiB of rows): kernel overhead isn't worth it.
        return _ref_jnp(pred_f, act_f)

    main = rows * LANE
    tail = n - main                        # < 128 ragged elements

    # No full-array zero-pad: when the flat size isn't a multiple of 128 we
    # run the kernel on the 128-aligned prefix and add the tiny tail with
    # plain jnp.  (The prefix slice may still materialize a copy for ragged
    # shapes; for the common n % 128 == 0 case this is a pure zero-copy view.)
    p2 = (pred_f if tail == 0 else pred_f[:main]).reshape(rows, LANE)
    a2 = (act_f if tail == 0 else act_f[:main]).reshape(rows, LANE)

    # Row tile: big (4 MiB f32 blocks by default), multiple of the dtype's
    # sublane packing, never larger than the slab.
    tile = min(tile_rows, rows)
    tile = max(align, (tile // align) * align)

    # W parallel accumulators (breaks the serial vadd chain on v7x).
    w = 1
    for cand in (8, 4, 2, 1):
        if tile % (cand * SUB) == 0:
            w = cand
            break

    num_cores = _num_tensorcores()
    nb = pl.cdiv(rows, tile)               # total row blocks
    bpc = pl.cdiv(nb, num_cores)           # row blocks per TensorCore
    # Mask needed only if the (cores x bpc) grid does not tile `rows` exactly.
    need_mask = (num_cores * bpc * tile) != rows

    kernel = _make_kernel(tile, w, bpc, rows, need_mask)

    def in_map(c, i):
        # Clamp so the DMA never starts past the slab; duplicate blocks
        # (uneven v7x split) are fully masked out inside the kernel.
        return (jnp.minimum(c * bpc + i, nb - 1), 0)

    out = pl.pallas_call(
        kernel,
        out_shape=jax.ShapeDtypeStruct((num_cores, w, SUB, LANE), jnp.float32),
        grid_spec=pltpu.PrefetchScalarGridSpec(
            num_scalar_prefetch=0,
            grid=(num_cores, bpc),
            in_specs=[
                pl.BlockSpec((tile, LANE), in_map),
                pl.BlockSpec((tile, LANE), in_map),
            ],
            out_specs=pl.BlockSpec((1, w, SUB, LANE), lambda c, i: (c, 0, 0, 0)),
        ),
        compiler_params=pltpu.CompilerParams(
            # Outer axis -> megacore sharding on v7x (size 1 elsewhere);
            # inner axis is the reduction (output block resident across it).
            dimension_semantics=("parallel", "arbitrary"),
            # 16 MiB of double-buffered inputs + elementwise temps; stays
            # well inside v7x's 64 MiB physical VMEM.
            vmem_limit_bytes=40 * 1024 * 1024,
        ),
        cost_estimate=pl.CostEstimate(
            flops=5 * main,
            transcendentals=main,
            bytes_accessed=main * (pred.dtype.itemsize + actual.dtype.itemsize)
            + num_cores * w * SUB * LANE * 4,
        ),
    )(p2, a2)

    # Single cross-lane reduction of the per-core (w,8,128) partials.
    loss = jnp.sum(out)
    if tail:
        loss = loss + _ref_jnp(pred_f[main:], act_f[main:])
    return loss


if __name__ == "__main__":
    key = jax.random.PRNGKey(0)
    k1, k2 = jax.random.split(key)

    # Small shapes consistent with an arbitrary elementwise loss: (B, C, H, W)
    shape = (2, 4, 16, 16)
    pred = jax.random.normal(k1, shape, dtype=jnp.float32)
    # actual must be > -1 for log(actual + 1); use a positive distribution
    actual = jax.random.uniform(k2, shape, dtype=jnp.float32,
                                minval=0.0, maxval=2.0)

    loss = jax.block_until_ready(ssle_loss(pred, actual))
    ref = jnp.sum((pred - jnp.log(actual + 1.0)) ** 2)
    assert jnp.allclose(loss, ref, rtol=1e-5, atol=1e-5), (loss, ref)

    # Also exercise the ragged / uneven-block path (gated mask + jnp tail).
    big_shape = (3, 5, 37, 129)    # 71595 elements (not a multiple of 128)
    bp = jax.random.normal(k1, big_shape, dtype=jnp.float32)
    ba = jax.random.uniform(k2, big_shape, dtype=jnp.float32,
                            minval=0.0, maxval=2.0)
    big_loss = jax.block_until_ready(ssle_loss(bp, ba))
    big_ref = jnp.sum((bp - jnp.log(ba + 1.0)) ** 2)
    assert jnp.allclose(big_loss, big_ref, rtol=1e-4, atol=1e-4), (big_loss, big_ref)

    print("KERNEL_OK")
</pallas_src>

<mosaic_0001>
module attributes {stable_mosaic.version = 11 : i64} {
  func.func @kernel(%arg0: i32, %arg1: i32, %arg2: memref<16x128xf32, #tpu.memory_space<vmem>>, %arg3: memref<16x128xf32, #tpu.memory_space<vmem>>, %arg4: memref<1x2x8x128xf32, #tpu.memory_space<vmem>>) attributes {dimension_semantics = [#tpu.dimension_semantics<parallel>, #tpu.dimension_semantics<arbitrary>], iteration_bounds = array<i64: 1, 1>, scalar_prefetch = 0 : i64, scratch_operands = 0 : i64, tpu.core_type = #tpu.core_type<tc>, window_params = [{transform_indices = @transform_0, window_bounds = array<i64: 16, 128>}, {transform_indices = @transform_1, window_bounds = array<i64: 16, 128>}, {transform_indices = @transform_2, window_bounds = array<i64: 1, 2, 8, 128>}]} {
    %c0_i32 = arith.constant 0 : i32
    %0 = arith.cmpi eq, %arg1, %c0_i32 : i32
    %1 = arith.extui %0 : i1 to i32
    %c0_i32_0 = arith.constant 0 : i32
    %2 = arith.cmpi ne, %1, %c0_i32_0 : i32
    scf.if %2 {
      %cst_13 = arith.constant 0.000000e+00 : f32
      %16 = vector.broadcast %cst_13 : f32 to vector<1x2x8x128xf32>
      %c0_14 = arith.constant 0 : index
      %c0_15 = arith.constant 0 : index
      %c0_16 = arith.constant 0 : index
      %c0_17 = arith.constant 0 : index
      %17 = vector.load %arg4[%c0_14, %c0_15, %c0_16, %c0_17] : memref<1x2x8x128xf32, #tpu.memory_space<vmem>>, vector<1x2x8x128xf32>
      tpu.vector_store %arg4[%c0_14, %c0_15, %c0_16, %c0_17], %16 {strides = array<i32>} : memref<1x2x8x128xf32, #tpu.memory_space<vmem>>, vector<1x2x8x128xf32>,
    } else {
    }
    %c0 = arith.constant 0 : index
    %c0_1 = arith.constant 0 : index
    %3 = vector.load %arg2[%c0, %c0_1] : memref<16x128xf32, #tpu.memory_space<vmem>>, vector<16x128xf32>
    %c0_2 = arith.constant 0 : index
    %c0_3 = arith.constant 0 : index
    %4 = vector.load %arg3[%c0_2, %c0_3] : memref<16x128xf32, #tpu.memory_space<vmem>>, vector<16x128xf32>
    %cst = arith.constant 1.000000e+00 : f32
    %5 = vector.broadcast %cst : f32 to vector<16x128xf32>
    %6 = arith.addf %4, %5 : vector<16x128xf32>
    %7 = math.log %6 : vector<16x128xf32>
    %8 = arith.subf %3, %7 : vector<16x128xf32>
    %9 = arith.mulf %8, %8 : vector<16x128xf32>
    %10 = vector.shape_cast %9 : vector<16x128xf32> to vector<1x2x8x128xf32>
    %cst_4 = arith.constant dense<0.000000e+00> : vector<2x8x128xf32>
    %11 = vector.multi_reduction <add>, %10, %cst_4 [0] : vector<1x2x8x128xf32> to vector<2x8x128xf32>
    %c0_5 = arith.constant 0 : index
    %c0_6 = arith.constant 0 : index
    %c0_7 = arith.constant 0 : index
    %c0_8 = arith.constant 0 : index
    %12 = vector.load %arg4[%c0_5, %c0_6, %c0_7, %c0_8] : memref<1x2x8x128xf32, #tpu.memory_space<vmem>>, vector<1x2x8x128xf32>
    %13 = vector.shape_cast %11 : vector<2x8x128xf32> to vector<1x2x8x128xf32>
    %14 = arith.addf %12, %13 : vector<1x2x8x128xf32>
    %c0_9 = arith.constant 0 : index
    %c0_10 = arith.constant 0 : index
    %c0_11 = arith.constant 0 : index
    %c0_12 = arith.constant 0 : index
    %15 = vector.load %arg4[%c0_9, %c0_10, %c0_11, %c0_12] : memref<1x2x8x128xf32, #tpu.memory_space<vmem>>, vector<1x2x8x128xf32>
    tpu.vector_store %arg4[%c0_9, %c0_10, %c0_11, %c0_12], %14 {strides = array<i32>} : memref<1x2x8x128xf32, #tpu.memory_space<vmem>>, vector<1x2x8x128xf32>,
    return
  }
  func.func @transform_0(%arg0: i32, %arg1: i32) -> (i32, i32) {
    %c1_i32 = arith.constant 1 : i32
    %0 = arith.muli %arg0, %c1_i32 : i32
    %1 = arith.addi %0, %arg1 : i32
    %c0_i32 = arith.constant 0 : i32
    %2 = arith.minsi %1, %c0_i32 : i32
    %c0_i32_0 = arith.constant 0 : i32
    %c0_i32_1 = arith.constant 0 : i32
    return %2, %c0_i32_0 : i32, i32
  }
  func.func @transform_1(%arg0: i32, %arg1: i32) -> (i32, i32) {
    %c1_i32 = arith.constant 1 : i32
    %0 = arith.muli %arg0, %c1_i32 : i32
    %1 = arith.addi %0, %arg1 : i32
    %c0_i32 = arith.constant 0 : i32
    %2 = arith.minsi %1, %c0_i32 : i32
    %c0_i32_0 = arith.constant 0 : i32
    %c0_i32_1 = arith.constant 0 : i32
    return %2, %c0_i32_0 : i32, i32
  }
  func.func @transform_2(%arg0: i32, %arg1: i32) -> (i32, i32, i32, i32) {
    %c0_i32 = arith.constant 0 : i32
    %c0_i32_0 = arith.constant 0 : i32
    %c0_i32_1 = arith.constant 0 : i32
    %c0_i32_2 = arith.constant 0 : i32
    return %arg0, %c0_i32, %c0_i32_0, %c0_i32_1 : i32, i32, i32, i32
  }
}

</mosaic_0001>

<bundles_post_ra>
// kernel: tpu_custom_call.1
= control target key start
LH: loop header
LB: loop body
LE: loop exit
PB: predicated region body
PF: predicated region fallthrough
CT: control target
= control target key end

     0   :  { %7 = vsyncpa [#allocation3], 0  ;;  %s242_s0 = inlined_call_operand.hbm [shape: f32[16,128], index: 0, kind: input, shape index: {}]   ;;  %s243_s1 = inlined_call_operand.hbm [shape: f32[16,128], index: 1, kind: input, shape index: {}]   ;;  %s244_s2 = inlined_call_operand.hbm [shape: f32[1,2,8,128], index: 2, kind: output, shape index: {}]  }
   0x1   :  { %8 = vsyncpa [#allocation6], 0 }
   0x2   :  { %9 = vsyncpa [#allocation4], 0  ;;  %s20_s11 = sshll.u32 %s242_s0, 4  ;;  %s204_s12 = smov [#allocation2]   ;;  %s21_s11 = int_to_ptr.hbm [resolvable:$true] %s20_s11 }
   0x3   :  { %s22_s13 = sshll.u32 %s204_s12, 4  ;;  %s39_s16 = sshll.u32 %s243_s1, 4  ;;  %s23_s13 = int_to_ptr.vmem [resolvable:$true] %s22_s13  ;;  %s40_s16 = int_to_ptr.hbm [resolvable:$true] %s39_s16 }
   0x4   :  { %s205_s17 = smov 128   ;;  %s206_s18 = smov 8  }
   0x5   :  { %28 = dma.hbm_to_vmem [thread:$0]  %s21_s11, 256, %s23_s13, [#allocation3], %s205_s17, %s205_s17, %s206_s18  }
   0x6   :  { %s207_s19 = smov [#allocation5]  }
   0x7   :  { %s41_s20 = sshll.u32 %s207_s19, 4  ;;  %s42_s20 = int_to_ptr.vmem [resolvable:$true] %s41_s20 }
   0x8   :  { %47 = dma.hbm_to_vmem [thread:$0]  %s40_s16, 256, %s42_s20, [#allocation6], %s205_s17, %s205_s17, %s206_s18  }
   0x9   :  { %198 = dma.done.wait [#allocation3], 256  }
   0xa   :  { %199 = vsyncadd [#allocation3], 4294967040 }
   0xb   :  { %200 = dma.done.wait [#allocation6], 256  }
   0xc   :  { %201 = vsyncadd [#allocation6], 4294967040  ;;  %v72_v0 = vld [vmem:[#allocation5] sm:$0xff]  ;;  %v73_v2 = vld [vmem:[#allocation5 + $0x8] sm:$0xff]  ;;  %s208_s0 = smov [#allocation7]   ;;  %s98_s23 = sshll.u32 %s244_s2, 4  ;;  %s99_s23 = int_to_ptr.hbm [resolvable:$true] %s98_s23 }
   0xd   :  { %v74_v1 = vadd.f32 1.0, %v72_v0  ;;  %v75_v3 = vadd.f32 1.0, %v73_v2  ;;  %v70_v5 = vld [vmem:[#allocation2] sm:$0xff]  ;;  %v71_v8 = vld [vmem:[#allocation2 + $0x8] sm:$0xff]  ;;  %s96_s1 = sshll.u32 %s208_s0, 4  ;;  %s97_s1 = int_to_ptr.vmem [resolvable:$true] %s96_s1 }
   0xf   :  { %122 = vlog2.f32 %v74_v1 }
  0x10   :  { %124 = vlog2.f32 %v75_v3 }
  0x15   :  { %v123_v4 = vpop.eup %122 }
  0x16   :  { %v125_v6 = vpop.eup %124  ;;  %v77_v7 = vmul.f32 0.6931472, %v123_v4 }
  0x17   :  { %v79_v9 = vmul.f32 0.6931472, %v125_v6 }
  0x18   :  { %v80_v10 = vsub.f32 %v70_v5, %v77_v7 }
  0x19   :  { %v81_v11 = vsub.f32 %v71_v8, %v79_v9 }
  0x1a   :  { %v82_v12 = vmul.f32 %v80_v10, %v80_v10 }
  0x1b   :  { %v83_v13 = vmul.f32 %v81_v11, %v81_v11 }
  0x1c   :  { %90 = vst [vmem:[#allocation7] sm:$0xff] %v82_v12 }
  0x1d   :  { %91 = vst [vmem:[#allocation7 + $0x8] sm:$0xff] %v83_v13 }
  0x1e   :  { %104 = dma.vmem_to_hbm [thread:$0]  %s97_s1, 256, %s99_s23, [#allocation4], %s205_s17, %s205_s17, %s206_s18  }
  0x1f   :  { %202 = dma.done.wait [#allocation4], 256  }
  0x20   :  { %203 = vsyncadd [#allocation4], 4294967040 }
  0x21   :  { %109 = vsyncpa [#allocation3], 1 }
  0x22   :  { %110 = vsyncpa [#allocation6], 1 }
  0x23   :  { %111 = vsyncpa [#allocation4], 1 }

</bundles_post_ra>
